<compile_context>
chip_gen: v7x
topology: tpu7x:2x2x1
jax: 0.10.0
libtpu: 0.0.40
codegen_flags: <defaults>
</compile_context>

<pallas_src>
import jax
import jax.numpy as jnp
from jax import lax
from jax.experimental import pallas as pl
from jax.experimental.pallas import tpu as pltpu

TID_PERIOD = 12 * 24      # 288 time-of-day slots
DIW_PERIOD = 7            # days in week


def laplacian_embeddings(k, n_nodes, edges, u_dist, sigma=6, eps=1e-6):
    """JAX port of the PyTorch helper (one-time init; plain XLA, not a kernel)."""
    assert 0 < k < n_nodes, f"0 < k < {n_nodes}"
    w = jnp.exp(-(u_dist.astype(jnp.float32) ** 2) / float(sigma) ** 2)
    adj = jnp.zeros((n_nodes, n_nodes), jnp.float32).at[edges[:, 0], edges[:, 1]].set(w)
    diagonals = adj.sum(0)
    diagonal_x = jnp.sqrt(diagonals[:, None] * diagonals[None, :])
    laplacian = jnp.eye(n_nodes, dtype=jnp.float32) - adj / diagonal_x
    evals, evecs = jnp.linalg.eigh(laplacian)
    _, idx = lax.top_k(evals, k)                      # torch.topk -> largest eigenvalues
    return evecs[:, idx].astype(jnp.float32)          # (n_nodes, k)


def _st_embedding_kernel(x_ref, tod_ref, dow_ref, sp_ref, tbl_ref, o_ref):
    """One grid step: assemble [x | spatial_emb | tid_emb | diw_emb] for G (b,t) groups.

    x_ref   : (G, n_nodes, 1) f32  input signal
    tod_ref : (G, 1)          i32  combined-table index for time-of-day, in [0, 288)
    dow_ref : (G, 1)          i32  combined-table index for day-of-week, in [288, 295)
    sp_ref  : (n_nodes, k)    f32  Laplacian eigenvector rows (VMEM resident)
    tbl_ref : (Kp, Dt)        f32  block-diagonal [tid_table ; diw_table], Kp = 384
    o_ref   : (G, n_nodes, 1 + k + Dt) f32
    """
    g, n_nodes, _ = x_ref.shape
    kp, dt = tbl_ref.shape
    k_sp = sp_ref.shape[1]

    # Temporal lookup once per (b, t) group: each one-hot row has exactly two hot columns
    # (one < 288 for time-of-day, one in [288, 295) for day-of-week); because the table
    # is block-diagonal, one MXU dot yields concat([tid_emb, diw_emb], -1) directly.
    lane = lax.broadcasted_iota(jnp.int32, (g, kp), 1)
    onehot = jnp.logical_or(lane == tod_ref[...], lane == dow_ref[...]).astype(jnp.float32)
    t_emb = jnp.dot(onehot, tbl_ref[...], preferred_element_type=jnp.float32)   # (G, Dt)

    # Broadcast the small operands over (group, node) and write the tile in ONE store.
    sp_b = jnp.broadcast_to(sp_ref[...][None, :, :], (g, n_nodes, k_sp))
    t_b = jnp.broadcast_to(t_emb[:, None, :], (g, n_nodes, dt))
    o_ref[...] = jnp.concatenate([x_ref[...], sp_b, t_b], axis=-1).astype(o_ref.dtype)


def _groups_per_block(n_groups, n_nodes, row_cap=4096):
    """(b, t) groups per grid block.

    Multiple of 8 (sublane alignment of the (G, 1) index blocks), capped at roughly
    row_cap output rows (groups * n_nodes) per step to amortize per-step overhead, and
    chosen so the parallel grid has >= 2 blocks whenever possible (v7x megacore split).
    """
    if n_groups <= 8:
        return n_groups                                    # block == full dim, always legal
    cap = max(8, (row_cap // max(n_nodes, 1)) // 8 * 8)
    half = max(8, ((pl.cdiv(n_groups, 2) + 7) // 8) * 8)   # ~half the groups, 8-aligned
    return min(cap, half)


def st_embedding_forward(x, t_list, spatial_emb, comb_table, tid_dim, diw_dim, *, row_cap=4096):
    B, T, n_nodes, dx = x.shape
    assert dx == 1, "x is expected to be (B, T, n_nodes, 1)"
    k = spatial_emb.shape[1]
    d_out = dx + k + tid_dim + diw_dim
    n_groups = B * T

    # Free row-major collapses; indices stay at (B*T, 1) granularity (no repeat to rows).
    x_g = x.reshape(n_groups, n_nodes, 1).astype(jnp.float32)
    t_flat = t_list.reshape(n_groups, 1)
    # jnp '%' keeps the sign of the divisor, so tod is always in [0, 288) and the shifted
    # dow index in [288, 295): the zero-padded table rows (295..383) are never selected.
    tod = (t_flat % TID_PERIOD).astype(jnp.int32)
    dow = ((t_flat // TID_PERIOD) % DIW_PERIOD).astype(jnp.int32) + TID_PERIOD

    g = _groups_per_block(n_groups, n_nodes, row_cap)
    grid = (pl.cdiv(n_groups, g),)

    out = pl.pallas_call(
        _st_embedding_kernel,
        out_shape=jax.ShapeDtypeStruct((n_groups, n_nodes, d_out), jnp.float32),
        grid_spec=pltpu.PrefetchScalarGridSpec(
            num_scalar_prefetch=0,
            grid=grid,
            in_specs=[
                pl.BlockSpec((g, n_nodes, 1), lambda i: (i, 0, 0)),   # x rows
                pl.BlockSpec((g, 1), lambda i: (i, 0)),               # time-of-day index
                pl.BlockSpec((g, 1), lambda i: (i, 0)),               # day-of-week index
                pl.BlockSpec((n_nodes, k), lambda i: (0, 0)),         # spatial emb (resident)
                pl.BlockSpec(comb_table.shape, lambda i: (0, 0)),     # combined table (resident)
            ],
            out_specs=pl.BlockSpec((g, n_nodes, d_out), lambda i: (i, 0, 0)),
        ),
        compiler_params=pltpu.CompilerParams(
            dimension_semantics=("parallel",),
            vmem_limit_bytes=32 * 1024 * 1024,   # explicit budget; fits v5e/v6e/v7x
        ),
    )(x_g, tod, dow, spatial_emb.astype(jnp.float32), comb_table)

    return out.reshape(B, T, n_nodes, d_out)


class SpatialTemporalEmbeddingPallas:
    """JAX/Pallas port of SpatialTemporalEmbedding (use_t_emb=True path)."""

    def __init__(self, k, n_nodes, edges, u_dist, sigma, key,
                 tid_dim=10, diw_dim=2, use_t_emb=True):
        self.k = k
        self.n_nodes = n_nodes
        self.tid_dim = tid_dim
        self.diw_dim = diw_dim
        self.use_t_emb = use_t_emb
        self.spatial_emb = laplacian_embeddings(k, n_nodes, edges, u_dist, sigma)

        assert use_t_emb, "only the use_t_emb=True path is ported to Pallas"
        # TODO(synk): use_t_emb=False branch (x ++ spatial only) not wired to the kernel.

        k_tid, k_diw = jax.random.split(key)
        # nn.Embedding default init: N(0, 1).
        self.time_in_day_emb = jax.random.normal(k_tid, (TID_PERIOD, tid_dim), jnp.float32)
        self.day_in_week_emb = jax.random.normal(k_diw, (DIW_PERIOD, diw_dim), jnp.float32)

        # Combined block-diagonal table built ONCE at init (no per-call transpose/concat);
        # contraction dim zero-padded up to a multiple of 128 for MXU alignment.  Padded
        # rows are never selected (indices stay < 288 + 7), so results are unchanged.
        kp = pl.cdiv(TID_PERIOD + DIW_PERIOD, 128) * 128          # 384
        comb = jnp.zeros((kp, tid_dim + diw_dim), jnp.float32)
        comb = comb.at[:TID_PERIOD, :tid_dim].set(self.time_in_day_emb)
        comb = comb.at[TID_PERIOD:TID_PERIOD + DIW_PERIOD, tid_dim:].set(self.day_in_week_emb)
        self.comb_table = comb

    def __call__(self, x, t_list=None):
        assert t_list is not None, "t_list should not be None"
        return st_embedding_forward(x, t_list, self.spatial_emb, self.comb_table,
                                    self.tid_dim, self.diw_dim)


def _reference(x, spatial_emb, tid_table, diw_table, t_list):
    """Pure-JAX mirror of the PyTorch forward."""
    B, T, n_nodes, _ = x.shape
    sp = jnp.broadcast_to(spatial_emb[None, None], (B, T) + spatial_emb.shape)
    out = jnp.concatenate([x, sp], axis=-1)
    tod = t_list % TID_PERIOD
    dow = (t_list // TID_PERIOD) % DIW_PERIOD
    t_emb = jnp.concatenate([tid_table[tod], diw_table[dow]], axis=-1)
    t_emb = jnp.broadcast_to(t_emb[:, :, None, :], (B, T, n_nodes, t_emb.shape[-1]))
    return jnp.concatenate([out, t_emb], axis=-1)


if __name__ == "__main__":
    B, T = 2, 8
    n_nodes, k_eig = 16, 8
    sigma = 6.0
    tid_dim, diw_dim = 10, 2

    key = jax.random.PRNGKey(0)
    k_dist, k_emb, k_x, k_t = jax.random.split(key, 4)

    # Symmetric ring graph so every node has positive degree (no NaNs in the Laplacian).
    src = jnp.arange(n_nodes, dtype=jnp.int32)
    dst = (src + 1) % n_nodes
    edges = jnp.concatenate([jnp.stack([src, dst], 1), jnp.stack([dst, src], 1)], 0)
    d = jax.random.uniform(k_dist, (n_nodes,), jnp.float32, 1.0, 5.0)
    u_dist = jnp.concatenate([d, d], 0)

    model = SpatialTemporalEmbeddingPallas(k_eig, n_nodes, edges, u_dist, sigma, k_emb,
                                           tid_dim=tid_dim, diw_dim=diw_dim)

    x = jax.random.normal(k_x, (B, T, n_nodes, 1), jnp.float32)
    t_list = jax.random.randint(k_t, (B, T), 0, TID_PERIOD * DIW_PERIOD, dtype=jnp.int32)

    out = model(x, t_list)
    out = jax.block_until_ready(out)

    d_out = 1 + k_eig + tid_dim + diw_dim
    assert out.shape == (B, T, n_nodes, d_out), out.shape

    ref = _reference(x, model.spatial_emb, model.time_in_day_emb, model.day_in_week_emb, t_list)
    assert jnp.allclose(out, ref, atol=1e-5, rtol=1e-5), float(jnp.max(jnp.abs(out - ref)))

    print("KERNEL_OK")
</pallas_src>

<mosaic_0001>
module attributes {stable_mosaic.version = 11 : i64} {
  func.func @_st_embedding_kernel(%arg0: i32, %arg1: memref<8x16x1xf32, #tpu.memory_space<vmem>>, %arg2: memref<8x1xi32, #tpu.memory_space<vmem>>, %arg3: memref<8x1xi32, #tpu.memory_space<vmem>>, %arg4: memref<16x8xf32, #tpu.memory_space<vmem>>, %arg5: memref<384x12xf32, #tpu.memory_space<vmem>>, %arg6: memref<8x16x21xf32, #tpu.memory_space<vmem>>) attributes {dimension_semantics = [#tpu.dimension_semantics<parallel>], iteration_bounds = array<i64: 2>, scalar_prefetch = 0 : i64, scratch_operands = 0 : i64, tpu.core_type = #tpu.core_type<tc>, window_params = [{transform_indices = @transform_0, window_bounds = array<i64: 8, 16, 1>}, {transform_indices = @transform_1, window_bounds = array<i64: 8, 1>}, {transform_indices = @transform_2, window_bounds = array<i64: 8, 1>}, {pipeline_mode = #tpu.pipeline_mode<synchronous>, transform_indices = @transform_3, window_bounds = array<i64: 16, 8>}, {pipeline_mode = #tpu.pipeline_mode<synchronous>, transform_indices = @transform_4, window_bounds = array<i64: 384, 12>}, {transform_indices = @transform_5, window_bounds = array<i64: 8, 16, 21>}]} {
    %0 = tpu.iota {dimensions = array<i32: 1>} : vector<8x384xi32>
    %c0 = arith.constant 0 : index
    %c0_0 = arith.constant 0 : index
    %1 = vector.load %arg2[%c0, %c0_0] : memref<8x1xi32, #tpu.memory_space<vmem>>, vector<8x1xi32>
    %2 = vector.broadcast %1 : vector<8x1xi32> to vector<8x384xi32>
    %3 = arith.cmpi eq, %0, %2 : vector<8x384xi32>
    %c0_1 = arith.constant 0 : index
    %c0_2 = arith.constant 0 : index
    %4 = vector.load %arg3[%c0_1, %c0_2] : memref<8x1xi32, #tpu.memory_space<vmem>>, vector<8x1xi32>
    %5 = vector.broadcast %4 : vector<8x1xi32> to vector<8x384xi32>
    %6 = arith.cmpi eq, %0, %5 : vector<8x384xi32>
    %7 = arith.ori %3, %6 : vector<8x384xi1>
    %8 = arith.extui %7 : vector<8x384xi1> to vector<8x384xi32>
    %9 = arith.sitofp %8 : vector<8x384xi32> to vector<8x384xf32>
    %c0_3 = arith.constant 0 : index
    %c0_4 = arith.constant 0 : index
    %10 = vector.load %arg5[%c0_3, %c0_4] : memref<384x12xf32, #tpu.memory_space<vmem>>, vector<384x12xf32>
    %cst = arith.constant dense<0.000000e+00> : vector<8x12xf32>
    %11 = tpu.matmul %9, %10, %cst {dimension_numbers = #tpu.dot_dimension_numbers<[1], [0], [0], [1], [0, 0, 1, 1], [], []>} : vector<8x384xf32>, vector<384x12xf32>, vector<8x12xf32> -> vector<8x12xf32>
    %c0_5 = arith.constant 0 : index
    %c0_6 = arith.constant 0 : index
    %12 = vector.load %arg4[%c0_5, %c0_6] : memref<16x8xf32, #tpu.memory_space<vmem>>, vector<16x8xf32>
    %13 = vector.shape_cast %12 : vector<16x8xf32> to vector<1x16x8xf32>
    %14 = vector.shape_cast %13 : vector<1x16x8xf32> to vector<1x16x8xf32>
    %15 = vector.broadcast %14 : vector<1x16x8xf32> to vector<8x16x8xf32>
    %16 = vector.shape_cast %11 : vector<8x12xf32> to vector<8x1x12xf32>
    %17 = vector.shape_cast %16 : vector<8x1x12xf32> to vector<8x1x12xf32>
    %18 = vector.broadcast %17 : vector<8x1x12xf32> to vector<8x16x12xf32>
    %c0_7 = arith.constant 0 : index
    %c0_8 = arith.constant 0 : index
    %c0_9 = arith.constant 0 : index
    %19 = vector.load %arg1[%c0_7, %c0_8, %c0_9] : memref<8x16x1xf32, #tpu.memory_space<vmem>>, vector<8x16x1xf32>
    %20 = tpu.concatenate %19, %15, %18 in 2 : vector<8x16x1xf32>, vector<8x16x8xf32>, vector<8x16x12xf32> -> vector<8x16x21xf32>
    %c0_10 = arith.constant 0 : index
    %c0_11 = arith.constant 0 : index
    %c0_12 = arith.constant 0 : index
    %21 = vector.load %arg6[%c0_10, %c0_11, %c0_12] : memref<8x16x21xf32, #tpu.memory_space<vmem>>, vector<8x16x21xf32>
    tpu.vector_store %arg6[%c0_10, %c0_11, %c0_12], %20 {strides = array<i32>} : memref<8x16x21xf32, #tpu.memory_space<vmem>>, vector<8x16x21xf32>,
    return
  }
  func.func @transform_0(%arg0: i32) -> (i32, i32, i32) {
    %c0_i32 = arith.constant 0 : i32
    %c0_i32_0 = arith.constant 0 : i32
    %c0_i32_1 = arith.constant 0 : i32
    return %arg0, %c0_i32, %c0_i32_0 : i32, i32, i32
  }
  func.func @transform_1(%arg0: i32) -> (i32, i32) {
    %c0_i32 = arith.constant 0 : i32
    %c0_i32_0 = arith.constant 0 : i32
    return %arg0, %c0_i32 : i32, i32
  }
  func.func @transform_2(%arg0: i32) -> (i32, i32) {
    %c0_i32 = arith.constant 0 : i32
    %c0_i32_0 = arith.constant 0 : i32
    return %arg0, %c0_i32 : i32, i32
  }
  func.func @transform_3(%arg0: i32) -> (i32, i32) {
    %c0_i32 = arith.constant 0 : i32
    %c0_i32_0 = arith.constant 0 : i32
    %c0_i32_1 = arith.constant 0 : i32
    return %c0_i32, %c0_i32_0 : i32, i32
  }
  func.func @transform_4(%arg0: i32) -> (i32, i32) {
    %c0_i32 = arith.constant 0 : i32
    %c0_i32_0 = arith.constant 0 : i32
    %c0_i32_1 = arith.constant 0 : i32
    return %c0_i32, %c0_i32_0 : i32, i32
  }
  func.func @transform_5(%arg0: i32) -> (i32, i32, i32) {
    %c0_i32 = arith.constant 0 : i32
    %c0_i32_0 = arith.constant 0 : i32
    %c0_i32_1 = arith.constant 0 : i32
    return %arg0, %c0_i32, %c0_i32_0 : i32, i32, i32
  }
}

</mosaic_0001>

<bundles_post_ra>
// kernel: tpu_custom_call.1
= control target key start
LH: loop header
LB: loop body
LE: loop exit
PB: predicated region body
PF: predicated region fallthrough
CT: control target
= control target key end

     0   :  { %10 = vsyncpa [#allocation3], 0  ;;  %s1462_s0 = inlined_call_operand.vmem [shape: f32[16,16,1], index: 0, kind: input, shape index: {}]   ;;  %s1463_s1 = inlined_call_operand.vmem [shape: s32[16,1], index: 1, kind: input, shape index: {}]   ;;  %s1464_s2 = inlined_call_operand.vmem [shape: s32[16,1], index: 2, kind: input, shape index: {}]   ;;  %s1465_s3 = inlined_call_operand.vmem [shape: f32[16,8], index: 3, kind: input, shape index: {}]   ;;  %s1466_s4 = inlined_call_operand.vmem [shape: f32[384,12], index: 4, kind: input, shape index: {}]   ;;  %s1467_s5 = inlined_call_operand.hbm [shape: f32[16,16,21], index: 5, kind: output, shape index: {}]  }
   0x1   :  { %12 = vsyncpa [#allocation3 + $0x1], 0  ;;  %s1085_s18 = smov 0   ;;  %s1087_s19 = smov 0  }
   0x2   :  { %s1089_s20 = smov 0   ;;  %s1091_s21 = smov 0  }
   0x3 LB: > { %s1106_s22 = sadd.s32 4294967295, %s1042_s21   ;;  %s762_s23 = sadd.s32 4294967294, %s1042_s21   ;;  %s1042_s21 = sphi %s1091_s21, %s1473_s21   ;;  %s1038_s20 = sphi %s1089_s20, %s1472_s20   ;;  %s1034_s19 = sphi %s1087_s19, %s1471_s19   ;;  %s1030_s18 = sphi %s1085_s18, %s1470_s18  }
   0x4   : > { %s1110_s24 = sadd.s32 1, %s1042_s21   ;;  %s145_s25 = sadd.s32 1, %s1038_s20 }
   0x5   : > { %s142_s26 = ssub.s32 %s1042_s21, %s1110_s24  ;;  %p155_p0 = scmp.ne.s32.totalorder %s1038_s20, %s1034_s19 }
   0x6   : > { %p143_p1 = scmp.eq.s32.totalorder %s142_s26, 0  ;;  %p156_p2 = scmp.eq.s32.totalorder %s1106_s22, 1 }
   0x7   : > { %p161_p3 = scmp.ne.s32.totalorder %s1034_s19, %s1030_s18  ;;  %p162_p4 = scmp.eq.s32.totalorder %s762_s23, 1 }
   0x8   : > { %s1121_s27 = scalar_select %p143_p1, %s1038_s20, %s145_s25  }
   0x9   : > { %p1123_p5 = por %p156_p2, %p155_p0  ;;  %p1127_p6 = por %p162_p4, %p161_p3 }
   0xa   : > { %p765_p7 = scmp.ge.s32.totalorder %s1042_s21, 1  ;;  %p210_p8 = scmp.lt.s32.totalorder %s1042_s21, 3 }
   0xc   : > { %p211_p9 = pnand %p765_p7, %p210_p8 }
   0xd   : > { %p254_p10 = scmp.lt.s32.totalorder (!%p211_p9), %s1106_s22, 1  ;;  %v306_v0 = vld [vmem:[%s1466_s4 + $0x80] sm:$0xff] (!%p211_p9)  ;;  %v307_v1 = vld [vmem:[%s1466_s4 + $0x88] sm:$0xff] (!%p211_p9)  ;;  %v1044_v3 = vmov (!%p211_p9), 0   ;;  %v1045_v4 = vmov (!%p211_p9), 0.0|0.0   ;;  %v308_v11 = vld [vmem:[%s1466_s4 + $0x90] sm:$0xff] (!%p211_p9) }
   0xe   : > { %214 = sbr.rel (%p211_p9) target bundleno = 530 (0x212), region = 40  ;;  %v322_v2 = vld [vmem:[%s1466_s4 + $0x100] sm:$0xff] (!%p211_p9)  ;;  %979 = vset.pattern.permute.xlu0 (!%p211_p9), %v1044_v3  ;;  %906 = vmatprep.subr.bf16.mxu1 (!%p211_p9), %v1045_v4  ;;  %v874_v5 = vpack.c.bf16 (!%p211_p9), %v307_v1, %v306_v0  ;;  %v323_v6 = vld [vmem:[%s1466_s4 + $0x108] sm:$0xff] (!%p211_p9)  ;;  %v309_v12 = vld [vmem:[%s1466_s4 + $0x98] sm:$0xff] (!%p211_p9)  ;;  %vm1046_vm0 = vmmov (!%p211_p9), 0   ;;  %v1047_v49 = vmov (!%p211_p9), 0.0  }
   0xf   : > { %v290_v7 = vld [vmem:[%s1466_s4] sm:$0xff] (!%p211_p9)  ;;  %v291_v8 = vld [vmem:[%s1466_s4 + $0x8] sm:$0xff] (!%p211_p9)  ;;  %v907_v9 = vpack.c.bf16 (!%p211_p9), %v323_v6, %v322_v2  ;;  %v324_v13 = vld [vmem:[%s1466_s4 + $0x110] sm:$0xff] (!%p211_p9)  ;;  %v878_v14 = vpack.c.bf16 (!%p211_p9), %v309_v12, %v308_v11  ;;  %871 = vmatprep.mubr.msk.f32.mxu1 (!%p211_p9), %vm1046_vm0, %v1047_v49  ;;  %s1049_s16 = smov (!%p211_p9), 1   ;;  %s1051_s26 = smov (!%p211_p9), 9   ;;  %vm610_vm10 = vcmask (!%p211_p9), 7168  }
  0x10   : > { %v876_v10 = vpack.c.bf16 (!%p211_p9), %v291_v8, %v290_v7  ;;  %875 = vmatprep.subr.bf16.mxu0 (!%p211_p9), %v874_v5  ;;  %v325_v15 = vld [vmem:[%s1466_s4 + $0x118] sm:$0xff] (!%p211_p9)  ;;  %v292_v16 = vld [vmem:[%s1466_s4 + $0x10] sm:$0xff] (!%p211_p9)  ;;  %v310_v20 = vld [vmem:[%s1466_s4 + $0xa0] sm:$0xff] (!%p211_p9)  ;;  %s244_s6 = sand.u32 (!%p211_p9), 1, %s1034_s19   ;;  %vm627_vm11 = vcmask (!%p211_p9), 72704   ;;  %vm644_vm12 = vcmask (!%p211_p9), 171008  }
  0x11   : > { %v293_v17 = vld [vmem:[%s1466_s4 + $0x18] sm:$0xff] (!%p211_p9)  ;;  %908 = vmatpush3.bf16.msra.mxu1 (!%p211_p9), %v907_v9  ;;  %v910_v18 = vpack.c.bf16 (!%p211_p9), %v325_v15, %v324_v13  ;;  %v311_v21 = vld [vmem:[%s1466_s4 + $0xa8] sm:$0xff] (!%p211_p9)  ;;  %v326_v22 = vld [vmem:[%s1466_s4 + $0x120] sm:$0xff] (!%p211_p9)  ;;  %s766_s9 = sshll.u32 (!%p211_p9), %s244_s6, 7  ;;  %s1052_s25 = smov (!%p211_p9), [#allocation2]  }
  0x12   : > { %877 = vmatpush3.bf16.msra.mxu0 (!%p211_p9), %v876_v10  ;;  %v880_v19 = vpack.c.bf16 (!%p211_p9), %v293_v17, %v292_v16  ;;  %909 = vmatprep.subr.bf16.mxu1 (!%p211_p9), %v1045_v4  ;;  %v882_v23 = vpack.c.bf16 (!%p211_p9), %v311_v21, %v310_v20  ;;  %v327_v24 = vld [vmem:[%s1466_s4 + $0x128] sm:$0xff] (!%p211_p9)  ;;  %v294_v25 = vld [vmem:[%s1466_s4 + $0x20] sm:$0xff] (!%p211_p9)  ;;  %v312_v28 = vld [vmem:[%s1466_s4 + $0xb0] sm:$0xff] (!%p211_p9)  ;;  %v1048_v20 = vmov (!%p211_p9), 1.0   ;;  %s1324_s11 = scalar_lea.vmem (!%p211_p9), [#allocation2], %s766_s9 }
  0x13   : > { %879 = vmatprep.subr.bf16.mxu0 (!%p211_p9), %v878_v14  ;;  %v295_v26 = vld [vmem:[%s1466_s4 + $0x28] sm:$0xff] (!%p211_p9)  ;;  %v313_v29 = vld [vmem:[%s1466_s4 + $0xb8] sm:$0xff] (!%p211_p9)  ;;  %v913_v31 = vpack.c.bf16 (!%p211_p9), %v327_v24, %v326_v22  ;;  %v328_v33 = vld [vmem:[%s1466_s4 + $0x130] sm:$0xff] (!%p211_p9)  ;;  %v263_v14 = vlaneseq (!%p211_p9)  ;;  %v1050_v22 = vmov (!%p211_p9), 1966171168   ;;  %s676_s12 = sshll.u32 (!%p211_p9), %s1324_s11, 4  ;;  %s1403_s12 = int_to_ptr.vmem [resolvable:$true] %s676_s12 }
  0x14   : > { %v884_v32 = vpack.c.bf16 (!%p211_p9), %v295_v26, %v294_v25  ;;  %v886_v34 = vpack.c.bf16 (!%p211_p9), %v313_v29, %v312_v28  ;;  %v329_v35 = vld [vmem:[%s1466_s4 + $0x138] sm:$0xff] (!%p211_p9)  ;;  %v296_v36 = vld [vmem:[%s1466_s4 + $0x30] sm:$0xff] (!%p211_p9)  ;;  %v314_v38 = vld [vmem:[%s1466_s4 + $0xc0] sm:$0xff] (!%p211_p9)  ;;  %s980_s23 = scalar_lea.vmem (!%p211_p9), %s1403_s12, 2048 }
  0x15   : > { %s255_s17 = scalar_select %p254_p10, %s1106_s22, 1  ;;  %911 = vmatpush3.bf16.msra.mxu1 %v910_v18  ;;  %v297_v37 = vld [vmem:[%s1466_s4 + $0x38] sm:$0xff]  ;;  %v315_v39 = vld [vmem:[%s1466_s4 + $0xc8] sm:$0xff]  ;;  %v916_v40 = vpack.c.bf16 %v329_v35, %v328_v33  ;;  %v330_v42 = vld [vmem:[%s1466_s4 + $0x140] sm:$0xff]  ;;  %v264_v15 = vand.u32 127, %v263_v14  ;;  %v486_v25 = vshrl.u32 %v263_v14, 7 }
  0x16   : > { %881 = vmatpush3.bf16.msra.mxu0 %v880_v19  ;;  %912 = vmatprep.subr.bf16.mxu1 %v1045_v4  ;;  %v888_v41 = vpack.c.bf16 %v297_v37, %v296_v36  ;;  %v890_v43 = vpack.c.bf16 %v315_v39, %v314_v38  ;;  %v331_v44 = vld [vmem:[%s1466_s4 + $0x148] sm:$0xff]  ;;  %v298_v45 = vld [vmem:[%s1466_s4 + $0x40] sm:$0xff]  ;;  %v316_v47 = vld [vmem:[%s1466_s4 + $0xd0] sm:$0xff]  ;;  %p981_p12 = scmp.ne.s32.totalorder %s1403_s12, %s980_s23 }
  0x17   : > { %s770_s14 = sshll.u32 %s255_s17, 3  ;;  %883 = vmatprep.subr.bf16.mxu0 %v882_v23  ;;  %v299_v46 = vld [vmem:[%s1466_s4 + $0x48] sm:$0xff]  ;;  %v317_v48 = vld [vmem:[%s1466_s4 + $0xd8] sm:$0xff]  ;;  %v919_v50 = vpack.c.bf16 %v331_v44, %v330_v42  ;;  %v332_v52 = vld [vmem:[%s1466_s4 + $0x150] sm:$0xff]  ;;  %v265_v17 = vadd.s32 128, %v264_v15  ;;  %v266_v18 = vadd.s32 256, %v264_v15  ;;  %v483_v23 = vunpack.c.l.s4 %v1050_v22 }
  0x18   : > { %s257_s17 = scalar_lea.vmem %s1463_s1, %s770_s14  ;;  %s261_s10 = scalar_lea.vmem %s1464_s2, %s770_s14  ;;  %v892_v51 = vpack.c.bf16 %v299_v46, %v298_v45  ;;  %v894_v53 = vpack.c.bf16 %v317_v48, %v316_v47  ;;  %v333_v54 = vld [vmem:[%s1466_s4 + $0x158] sm:$0xff]  ;;  %v300_v55 = vld [vmem:[%s1466_s4 + $0x50] sm:$0xff]  ;;  %v318_v57 = vld [vmem:[%s1466_s4 + $0xe0] sm:$0xff]  ;;  %v532_v33 = vsub.s32 0, %v486_v25 }
  0x19   : > { %v267_v27 = vld [vmem:[%s257_s17] sm:$0xff]  ;;  %914 = vmatpush3.bf16.msra.mxu1 %v913_v31  ;;  %v301_v56 = vld [vmem:[%s1466_s4 + $0x58] sm:$0xff]  ;;  %v319_v58 = vld [vmem:[%s1466_s4 + $0xe8] sm:$0xff]  ;;  %v922_v59 = vpack.c.bf16 %v333_v54, %v332_v52  ;;  %v484_v24 = vunpack.c.0.s8 %v483_v23  ;;  %s767_s14 = sshll.u32 %s1106_s22, 3  ;;  %p982_p13 = pnand %p981_p12, %p1123_p5 }
  0x1a   : > { %269 = vperm.xlu0 %979, %v267_v27   ;;  %v274_v30 = vld [vmem:[%s261_s10] sm:$0xff]  ;;  %885 = vmatpush3.bf16.msra.mxu0 %v884_v32  ;;  %v896_v60 = vpack.c.bf16 %v301_v56, %v300_v55  ;;  %v898_v62 = vpack.c.bf16 %v319_v58, %v318_v57  ;;  %v335_v63 = vld [vmem:[%s1466_s4 + $0x168] sm:$0xff]  ;;  %v320_v2 = vld [vmem:[%s1466_s4 + $0xf0] sm:$0xff]  ;;  %p248_p11 = scmp.lt.s32.totalorder %s767_s14, 15  ;;  %s786_s10 = sshll.u32 %s1106_s22, 11 }
  0x1b   : > { %915 = vmatprep.subr.bf16.mxu1 %v1045_v4  ;;  %887 = vmatprep.subr.bf16.mxu0 %v886_v34  ;;  %v334_v61 = vld [vmem:[%s1466_s4 + $0x160] sm:$0xff]  ;;  %v303_v1 = vld [vmem:[%s1466_s4 + $0x68] sm:$0xff]  ;;  %v321_v3 = vld [vmem:[%s1466_s4 + $0xf8] sm:$0xff]  ;;  %s1401_s15 = scalar_lea.hbm %s1467_s5, %s786_s10  ;;  %p983_p0 = pneg %p982_p13 }
  0x1c   : > { %v302_v0 = vld [vmem:[%s1466_s4 + $0x60] sm:$0xff]  ;;  %v925_v5 = vpack.c.bf16 %v335_v63, %v334_v61  ;;  %v336_v7 = vld [vmem:[%s1466_s4 + $0x170] sm:$0xff]  ;;  %v902_v8 = vpack.c.bf16 %v321_v3, %v320_v2  ;;  %v337_v9 = vld [vmem:[%s1466_s4 + $0x178] sm:$0xff]  ;;  %s1475_s14 = smov (!%p248_p11, %s767_s14), 15 }
  0x1d   : > { %917 = vmatpush3.bf16.msra.mxu1 %v916_v40  ;;  %v900_v6 = vpack.c.bf16 %v303_v1, %v302_v0  ;;  %v304_v10 = vld [vmem:[%s1466_s4 + $0x70] sm:$0xff]  ;;  %v305_v11 = vld [vmem:[%s1466_s4 + $0x78] sm:$0xff]  ;;  %v928_v12 = vpack.c.bf16 %v337_v9, %v336_v7  ;;  %v479_v21 = vld [vmem:[%s1465_s3 + $0x8] sm:$0xff]  ;;  %s784_s30 = sshll.u32 %s1475_s14, 4 }
  0x1e   : > { %276 = vperm.xlu0 %979, %v274_v30   ;;  %889 = vmatpush3.bf16.msra.mxu0 %v888_v41  ;;  %v904_v13 = vpack.c.bf16 %v305_v11, %v304_v10  ;;  %v487_v30 = vsub.s32 %v484_v24, %v486_v25  ;;  %s1306_s8 = scalar_lea.vmem %s1462_s0, %s784_s30 }
  0x1f   : > { %918 = vmatprep.subr.bf16.mxu1 %v1045_v4  ;;  %891 = vmatprep.subr.bf16.mxu0 %v890_v43  ;;  %v563_v57 = vld [vmem:[%s1306_s8 + $0x8] sm:$0xff]  ;;  %v562_v58 = vld [vmem:[%s1306_s8] sm:$0xff]  ;;  %v565_v61 = vld [vmem:[%s1306_s8 + $0x18] sm:$0xff] }
  0x20   : > { %v566_v2 = vld [vmem:[%s1306_s8 + $0x20] sm:$0xff]  ;;  %v567_v3 = vld [vmem:[%s1306_s8 + $0x28] sm:$0xff]  ;;  %v568_v10 = vld [vmem:[%s1306_s8 + $0x30] sm:$0xff] }
  0x21   : > { %920 = vmatpush3.bf16.msra.mxu1 %v919_v50  ;;  %v569_v11 = vld [vmem:[%s1306_s8 + $0x38] sm:$0xff]  ;;  %v572_v23 = vld [vmem:[%s1306_s8 + $0x50] sm:$0xff] }
  0x22   : > { %893 = vmatpush3.bf16.msra.mxu0 %v892_v51  ;;  %921 = vmatprep.subr.bf16.mxu1 %v1045_v4  ;;  %v573_v24 = vld [vmem:[%s1306_s8 + $0x58] sm:$0xff] }
  0x23   : > { %895 = vmatprep.subr.bf16.mxu0 %v894_v53 }
  0x25   : > { %923 = vmatpush3.bf16.msra.mxu1 %v922_v59 }
  0x26   : > { %897 = vmatpush3.bf16.msra.mxu0 %v896_v60  ;;  %924 = vmatprep.subr.bf16.mxu1 %v1045_v4  ;;  %v564_v60 = vld [vmem:[%s1306_s8 + $0x10] sm:$0xff] }
  0x27   : > { %899 = vmatprep.subr.bf16.mxu0 %v898_v62 }
  0x29   : > { %926 = vmatpush3.bf16.msra.mxu1 %v925_v5 }
  0x2a   : > { %901 = vmatpush3.bf16.msra.mxu0 %v900_v6  ;;  %927 = vmatprep.subr.bf16.mxu1 %v1045_v4  ;;  %v478_v4 = vld [vmem:[%s1465_s3] sm:$0xff] }
  0x2b   : > { %903 = vmatprep.subr.bf16.mxu0 %v902_v8  ;;  %580 = vrot.lane.b32.xlu1 %v478_v4, %s1049_s16 }
  0x2d   : > { %929 = vmatpush3.bf16.msra.mxu1 %v928_v12 }
  0x2e   : > { %905 = vmatpush3.bf16.msra.mxu0 %v904_v13 }
  0x2f   : > { %582 = vrot.lane.b32.xlu1 %v479_v21, %s1049_s16  ;;  %s1421_s16 = scalar_lea.sflag [#allocation3], %s244_s6 }
  0x99   : > { %v270_v16 = vpop.permute.xlu0 %269 }
  0x9a   : > { %vm272_vm3 = vcmp.eq.s32.totalorder %v265_v17, %v270_v16  ;;  %vm273_vm5 = vcmp.eq.s32.totalorder %v266_v18, %v270_v16  ;;  %vm271_vm7 = vcmp.eq.s32.totalorder %v264_v15, %v270_v16 }
  0x9d   : > { %v277_v19 = vpop.permute.xlu0 %276  ;;  %v1300_v55 = vpop.permute.xlu1 %580 }
  0x9e   : > { %vm278_vm1 = vcmp.eq.s32.totalorder %v264_v15, %v277_v19  ;;  %vm280_vm2 = vcmp.eq.s32.totalorder %v266_v18, %v277_v19  ;;  %vm279_vm4 = vcmp.eq.s32.totalorder %v265_v17, %v277_v19  ;;  %v611_v63 = vsel %vm610_vm10, %v562_v58, %v1300_v55  ;;  %v570_v17 = vld [vmem:[%s1306_s8 + $0x40] sm:$0xff]  ;;  %v571_v18 = vld [vmem:[%s1306_s8 + $0x48] sm:$0xff] }
  0x9f   : > { %vm282_vm6 = vmor %vm272_vm3, %vm279_vm4  ;;  %v613_v6 = vsel %vm610_vm10, %v564_v60, %v1300_v55  ;;  %v615_v13 = vsel %vm610_vm10, %v566_v2, %v1300_v55 }
  0xa0   : > { %775 = vmatprep.mubr.msk.f32.mxu0 %vm282_vm6, %v1048_v20  ;;  %vm283_vm8 = vmor %vm273_vm5, %vm280_vm2 }
  0xa1   : > { %872 = vmatmul.mubr.msk.f32.vlgmr.msra.gmra.mrb[0].mxu1 %vm283_vm8, %v1048_v20  ;;  %vm281_vm9 = vmor %vm271_vm7, %vm278_vm1  ;;  %v1308_v56 = vpop.permute.xlu1 %582 }
  0xa2   : > { %776 = vmatmul.mubr.msk.f32.vlgmr.msra.gmra.mrb[0].mxu0 %vm281_vm9, %v1048_v20  ;;  %v612_v59 = vsel %vm610_vm10, %v563_v57, %v1308_v56  ;;  %v614_v7 = vsel %vm610_vm10, %v565_v61, %v1308_v56  ;;  %v616_v14 = vsel %vm610_vm10, %v567_v3, %v1308_v56  ;;  %v617_v20 = vsel %vm610_vm10, %v568_v10, %v1300_v55 }
  0xa3   : > { %v618_v4 = vsel %vm610_vm10, %v569_v11, %v1308_v56 }
 0x174   : > { %v474_v26 = vpop.f32.mrb[0].mxu1 }
 0x175   : > { %v819_v27 = vpop.f32.mrb[0].mxu0  ;;  %v873_v28 = vpop.f32.mrb[1].mxu1 }
 0x176   : > { %v820_v29 = vpop.f32.mrb[1].mxu0 }
 0x177   : > { %v821_v31 = vadd.f32 %v820_v29, %v819_v27  ;;  %v620_v27 = vsel %vm610_vm10, %v571_v18, %v1308_v56 }
 0x179   : > { %v475_v32 = vadd.f32 %v821_v31, %v474_v26  ;;  %v619_v26 = vsel %vm610_vm10, %v570_v17, %v1300_v55  ;;  %v575_v31 = vld [vmem:[%s1306_s8 + $0x68] sm:$0xff] }
 0x17b   : > { %v481_v34 = vcombine.high %v475_v32, %v475_v32  ;;  %v488_v35 = vrot.slane %v475_v32, %v487_v30 }
 0x17d   : > { %v495_v36 = vrot.slane %v481_v34, %v487_v30  ;;  %v496_v37 = vcombine.high %v488_v35, %v488_v35  ;;  %v504_v38 = vrot.slane %v488_v35, %v487_v30  ;;  %v622_v34 = vsel %vm610_vm10, %v573_v24, %v1308_v56 }
 0x17f   : > { %v533_v39 = vrot.slane %v504_v38, %v532_v33  ;;  %v518_v40 = vrot.slane %v496_v37, %v487_v30  ;;  %v526_v41 = vcombine.high %v504_v38, %v504_v38  ;;  %v511_v42 = vrot.slane %v495_v36, %v487_v30  ;;  %v576_v37 = vld [vmem:[%s1306_s8 + $0x70] sm:$0xff]  ;;  %v577_v38 = vld [vmem:[%s1306_s8 + $0x78] sm:$0xff] }
 0x180   : > { %v497_v43 = vcombine.high %v495_v36, %v495_v36 }
 0x181   : > { %586 = vrot.lane.b32.xlu0 %v533_v39, %s1051_s26  ;;  %v537_v44 = vrot.slane %v518_v40, %v532_v33  ;;  %v541_v45 = vrot.slane %v526_v41, %v532_v33  ;;  %v528_v46 = vcombine.high %v518_v40, %v518_v40  ;;  %v549_v47 = vrot.slane %v511_v42, %v532_v33 }
 0x182   : > { %v525_v48 = vrot.slane %v497_v43, %v487_v30  ;;  %v527_v49 = vcombine.high %v511_v42, %v511_v42  ;;  %v574_v30 = vld [vmem:[%s1306_s8 + $0x60] sm:$0xff]  ;;  %v624_v41 = vsel %vm610_vm10, %v575_v31, %v1308_v56 }
 0x183   : > { %588 = vrot.lane.b32.xlu1 %v537_v44, %s1051_s26  ;;  %v545_v50 = vrot.slane %v528_v46, %v532_v33  ;;  %v623_v40 = vsel %vm610_vm10, %v574_v30, %v1300_v55  ;;  %v626_v46 = vsel %vm610_vm10, %v577_v38, %v1308_v56 }
 0x184   : > { %v553_v51 = vrot.slane %v525_v48, %v532_v33  ;;  %v557_v52 = vrot.slane %v527_v49, %v532_v33  ;;  %v529_v53 = vcombine.high %v525_v48, %v525_v48 }
 0x185   : > { %590 = vrot.lane.b32.xlu0 %v541_v45, %s1051_s26  ;;  %v625_v45 = vsel %vm610_vm10, %v576_v37, %v1300_v55 }
 0x186   : > { %v561_v54 = vrot.slane %v529_v53, %v532_v33  ;;  %v621_v33 = vsel %vm610_vm10, %v572_v23, %v1300_v55 }
 0x187   : > { %592 = vrot.lane.b32.xlu1 %v545_v50, %s1051_s26 }
 0x189   : > { %594 = vrot.lane.b32.xlu0 %v549_v47, %s1051_s26 }
 0x18b   : > { %596 = vrot.lane.b32.xlu1 %v553_v51, %s1051_s26 }
 0x18d   : > { %598 = vrot.lane.b32.xlu0 %v557_v52, %s1051_s26 }
 0x18f   : > { %600 = vrot.lane.b32.xlu1 %v561_v54, %s1051_s26  ;;  %s984_s26 = sshll.u32 %s1052_s25, 4  ;;  %s985_s26 = int_to_ptr.vmem [resolvable:$false] %s984_s26 }
 0x190   : > { %s986_s14 = scalar_lea.vmem %s985_s26, 4096  ;;  %p987_p1 = scmp.lt.s32.totalorder %s1403_s12, %s985_s26 }
 0x191   : > { %p988_p2 = scmp.lt.s32.totalorder %s986_s14, %s980_s23 }
 0x193   : > { %p989_p3 = por %p988_p2, %p987_p1 }
 0x195   : > { %p990_p4 = pnand %p989_p3, %p983_p0 }
 0x1f3   : > { %v587_v62 = vpop.permute.xlu0 %586 }
 0x1f4   : > { %v628_v0 = vsel %vm627_vm11, %v611_v63, %v587_v62  ;;  %v629_v1 = vsel %vm627_vm11, %v612_v59, %v587_v62 }
 0x1f5   : > { %645 = vst.msk [vmem:[%s1324_s11] sm:$0xff] %vm644_vm12, %v628_v0  ;;  %646 = vst.msk [vmem:[%s1324_s11 + $0x8] sm:$0xff] %vm644_vm12, %v629_v1  ;;  %v589_v5 = vpop.permute.xlu1 %588 }
 0x1f6   : > { %v630_v8 = vsel %vm627_vm11, %v613_v6, %v589_v5  ;;  %v631_v9 = vsel %vm627_vm11, %v614_v7, %v589_v5 }
 0x1f7   : > { %647 = vst.msk [vmem:[%s1324_s11 + $0x10] sm:$0xff] %vm644_vm12, %v630_v8  ;;  %648 = vst.msk [vmem:[%s1324_s11 + $0x18] sm:$0xff] %vm644_vm12, %v631_v9  ;;  %v591_v12 = vpop.permute.xlu0 %590 }
 0x1f8   : > { %v632_v15 = vsel %vm627_vm11, %v615_v13, %v591_v12  ;;  %v633_v16 = vsel %vm627_vm11, %v616_v14, %v591_v12 }
 0x1f9   : > { %649 = vst.msk [vmem:[%s1324_s11 + $0x20] sm:$0xff] %vm644_vm12, %v632_v15  ;;  %650 = vst.msk [vmem:[%s1324_s11 + $0x28] sm:$0xff] %vm644_vm12, %v633_v16  ;;  %v593_v19 = vpop.permute.xlu1 %592 }
 0x1fa   : > { %v634_v21 = vsel %vm627_vm11, %v617_v20, %v593_v19  ;;  %v635_v22 = vsel %vm627_vm11, %v618_v4, %v593_v19 }
 0x1fb   : > { %651 = vst.msk [vmem:[%s1324_s11 + $0x30] sm:$0xff] %vm644_vm12, %v634_v21  ;;  %652 = vst.msk [vmem:[%s1324_s11 + $0x38] sm:$0xff] %vm644_vm12, %v635_v22  ;;  %v595_v25 = vpop.permute.xlu0 %594 }
 0x1fc   : > { %v636_v28 = vsel %vm627_vm11, %v619_v26, %v595_v25  ;;  %v637_v29 = vsel %vm627_vm11, %v620_v27, %v595_v25 }
 0x1fd   : > { %653 = vst.msk [vmem:[%s1324_s11 + $0x40] sm:$0xff] %vm644_vm12, %v636_v28  ;;  %654 = vst.msk [vmem:[%s1324_s11 + $0x48] sm:$0xff] %vm644_vm12, %v637_v29  ;;  %v597_v32 = vpop.permute.xlu1 %596 }
 0x1fe   : > { %v638_v35 = vsel %vm627_vm11, %v621_v33, %v597_v32  ;;  %v639_v36 = vsel %vm627_vm11, %v622_v34, %v597_v32 }
 0x1ff   : > { %655 = vst.msk [vmem:[%s1324_s11 + $0x50] sm:$0xff] %vm644_vm12, %v638_v35  ;;  %656 = vst.msk [vmem:[%s1324_s11 + $0x58] sm:$0xff] %vm644_vm12, %v639_v36  ;;  %v599_v39 = vpop.permute.xlu0 %598 }
 0x200   : > { %v640_v42 = vsel %vm627_vm11, %v623_v40, %v599_v39  ;;  %v641_v43 = vsel %vm627_vm11, %v624_v41, %v599_v39 }
 0x201   : > { %657 = vst.msk [vmem:[%s1324_s11 + $0x60] sm:$0xff] %vm644_vm12, %v640_v42  ;;  %658 = vst.msk [vmem:[%s1324_s11 + $0x68] sm:$0xff] %vm644_vm12, %v641_v43  ;;  %v601_v44 = vpop.permute.xlu1 %600 }
 0x202   : > { %v642_v47 = vsel %vm627_vm11, %v625_v45, %v601_v44  ;;  %v643_v48 = vsel %vm627_vm11, %v626_v46, %v601_v44 }
 0x203   : > { %659 = vst.msk [vmem:[%s1324_s11 + $0x70] sm:$0xff] %vm644_vm12, %v642_v47  ;;  %660 = vst.msk [vmem:[%s1324_s11 + $0x78] sm:$0xff] %vm644_vm12, %v643_v48 }
 0x204   : > { %993 = shalt.err (!%p990_p4)
}
 0x205   : > { %s994_s30 = scalar_lea.hbm %s1401_s15, 2048  ;;  %s998_s17 = scalar_lea.hbm %s1467_s5, 4096 }
 0x206   : > { %p995_p7 = scmp.ne.s32.totalorder %s1401_s15, %s994_s30  ;;  %p999_p10 = scmp.lt.u32.totalorder %s1401_s15, %s1467_s5 }
 0x207   : > { %p1000_p11 = scmp.lt.u32.totalorder %s998_s17, %s994_s30  ;;  %p1002_p13 = scmp.lt.u32.totalorder %s994_s30, %s1401_s15 }
 0x208   : > { %p996_p8 = pnand %p995_p7, %p1123_p5 }
 0x209   : > { %p1001_p12 = por %p1000_p11, %p999_p10 }
 0x20a   : > { %p997_p9 = pneg %p996_p8 }
 0x20b   : > { %p1003_p0 = por %p1002_p13, %p1001_p12 }
 0x20d   : > { %p1004_p1 = pnand %p1003_p0, %p997_p9 }
 0x20f   : > { %1007 = shalt.err (!%p1004_p1)
}
 0x210   : > { %s1053_s11 = smov 128   ;;  %s1054_s10 = smov 8  }
 0x211   : > { %930 = dma.vmem_to_hbm [thread:$0]  (%p1123_p5), %s1403_s12, 2048, %s1401_s15, %s1421_s16, %s1053_s11, %s1053_s11, %s1054_s10  }
 0x212 PF: > { %p936_p2 = scmp.ge.s32.totalorder %s1042_s21, 2  ;;  %s691_s22 = sand.u32 1, %s1030_s18  }
 0x213   : > { %s692_s13 = scalar_lea.sflag [#allocation3], %s691_s22 }
 0x214   : > { %p933_p3 = pnand %p936_p2, %p1127_p6 }
 0x216   : > { %1025 = dma.done.wait (!%p933_p3), %s692_s13, 2048  }
 0x217   : > { %1027 = vsyncadd (!%p933_p3), %s692_s13, 4294965248  ;;  %p15_p4 = scmp.ge.s32.totalorder %s1110_s24, 4   ;;  %s1470_s18 = smov %s1034_s19 }
 0x218   : > { %s1471_s19 = smov %s1038_s20  ;;  %s1472_s20 = smov %s1121_s27 }
 0x219   : > { %s1473_s21 = smov %s1110_s24  ;;  %17 = sbr.rel (!%p15_p4) target bundleno = 3 (0x3), region = 81 }
 0x220   :  { %697 = vsyncpa [#allocation3], 1 }
 0x221   :  { %699 = vsyncpa [#allocation3 + $0x1], 1 }

</bundles_post_ra>
